<compile_context>
chip_gen: v7x
topology: tpu7x:2x2x1
jax: 0.10.0
libtpu: 0.0.40
codegen_flags: <defaults>
</compile_context>

<pallas_src>
from typing import List, Sequence, Tuple

import jax
import jax.numpy as jnp
from jax.experimental import pallas as pl
from jax.experimental.pallas import tpu as pltpu


def _round_up(x: int, m: int) -> int:
    return ((x + m - 1) // m) * m


def _bilinear_weight_matrix(in_size: int, padded_in: int, out_size: int,
                            dtype) -> jnp.ndarray:
    """(out_size, padded_in) interpolation matrix matching torch bilinear
    (align_corners=False: half-pixel centers, clamped).  Columns >= in_size
    are zero, so zero-padded inputs never contribute."""
    scale = in_size / out_size
    src = (jnp.arange(out_size, dtype=jnp.float32) + 0.5) * scale - 0.5
    src = jnp.maximum(src, 0.0)
    i0 = jnp.clip(jnp.floor(src).astype(jnp.int32), 0, in_size - 1)
    i1 = jnp.minimum(i0 + 1, in_size - 1)
    frac = jnp.clip(src - i0.astype(jnp.float32), 0.0, 1.0)
    w = ((1.0 - frac)[:, None] * jax.nn.one_hot(i0, padded_in, dtype=jnp.float32)
         + frac[:, None] * jax.nn.one_hot(i1, padded_in, dtype=jnp.float32))
    # TODO(synk): for large downscales on v5e, exploit the 2-tap structure with
    # a banded contraction + scalar-prefetched offsets instead of this dense
    # (out, padded_in) matrix.
    return w.astype(dtype)


def _resize_kernel(x_ref, wh_ref, wwt_ref, o_ref, acc_ref):
    """grid = (image n, height-tile k).
    x_ref   : (C, TH, Wp)   compute dtype  -- NCHW row tile of image n
    wh_ref  : (OH, TH)      height weights for this row tile (zero-padded)
    wwt_ref : (Wp, OW)      width weights (transposed); same block for all k
    o_ref   : (C, OH*OW)    lane-dense output slab, written at the last tile
    acc_ref : (OH, C*OW)    f32 accumulator (VMEM scratch)
    """
    C, TH, Wp = x_ref.shape
    OH = wh_ref.shape[0]
    OW = wwt_ref.shape[1]
    k = pl.program_id(1)

    @pl.when(k == 0)
    def _init():
        acc_ref[...] = jnp.zeros_like(acc_ref)

    # Pass 1 (width): one folded MXU matmul, M = C*TH, f32 accumulation.
    x = x_ref[...].reshape(C * TH, Wp)
    tmp = jnp.dot(x, wwt_ref[...], preferred_element_type=jnp.float32)  # (C*TH, OW)

    # Relayout (C, TH, OW) -> (TH, C*OW): XLU transpose (XLU otherwise idle) so
    # pass 2 is a single folded matmul instead of C tiny per-channel matmuls.
    t2 = jnp.swapaxes(tmp.reshape(C, TH, OW), 0, 1).reshape(TH, C * OW)
    t2 = t2.astype(x.dtype)

    # Pass 2 (height): partial contraction over this row tile, f32 accumulate.
    acc_ref[...] += jnp.dot(wh_ref[...], t2, preferred_element_type=jnp.float32)

    @pl.when(k == pl.num_programs(1) - 1)
    def _store():
        out = jnp.swapaxes(acc_ref[...].reshape(OH, C, OW), 0, 1)  # (C, OH, OW)
        o_ref[...] = out.reshape(C, OH * OW).astype(o_ref.dtype)   # lane-dense


def resize_preprocessor(imgs: Sequence[jnp.ndarray],
                        size: Tuple[int, int],
                        interpolation_mode: str = "bilinear",
                        *,
                        compute_dtype=jnp.bfloat16,
                        out_dtype=jnp.float32,
                        row_tile: int = 256,
                        ) -> Tuple[jnp.ndarray, List[Tuple[int, int]]]:
    """JAX/Pallas equivalent of kornia ResizePreProcessor.forward."""
    if interpolation_mode != "bilinear":
        # TODO(synk): nearest / bicubic / area / nearest-exact not implemented.
        raise NotImplementedError("only bilinear interpolation is implemented")

    OH, OW = int(size[0]), int(size[1])
    N = len(imgs)
    C = int(imgs[0].shape[0])
    assert all(int(im.shape[0]) == C for im in imgs), "all images must share C"
    original_sizes = [(int(im.shape[1]), int(im.shape[2])) for im in imgs]  # (H, W)

    max_h = max(h for h, _ in original_sizes)
    max_w = max(w for _, w in original_sizes)

    # Height (reduction) tiling: one tile for small sources, otherwise
    # 128-aligned row tiles so VMEM is bounded regardless of source size.
    hp_small = _round_up(max_h, 16)
    if hp_small <= row_tile:
        TH = Hp = hp_small
        KT = 1
    else:
        TH = _round_up(max(row_tile, 128), 128)
        Hp = _round_up(max_h, TH)
        KT = Hp // TH
    Wp = _round_up(max_w, 128)

    # Pad every image to (C, Hp, Wp) in the compute dtype and stack (NCHW).
    # Zero weight columns beyond the true H/W keep the padding inert.
    # TODO(synk): fuse cast+pad into the kernel (pl.ANY + manual DMA) or bucket
    # images by padded size to remove this extra HBM write+read of the batch.
    xs = [jnp.pad(im.astype(compute_dtype), ((0, 0), (0, Hp - h), (0, Wp - w)))
          for im, (h, w) in zip(imgs, original_sizes)]
    x = jnp.stack(xs, axis=0)                                       # (N, C, Hp, Wp)

    wh = jnp.stack([_bilinear_weight_matrix(h, Hp, OH, compute_dtype)
                    for h, _ in original_sizes])                    # (N, OH, Hp)
    wwt = jnp.stack([_bilinear_weight_matrix(w, Wp, OW, compute_dtype).T
                     for _, w in original_sizes])                   # (N, Wp, OW)
    # TODO(synk): pick width-first vs height-first per call by comparing
    # C*Hp*OW*(Wp+OH) vs C*Wp*OH*(Hp+OW) MACs for strongly anisotropic resizes.

    cb = jnp.dtype(compute_dtype).itemsize
    ob = jnp.dtype(out_dtype).itemsize
    blocks = (C * TH * Wp + OH * TH + Wp * OW) * cb + C * OH * OW * ob
    interm = (C * TH * OW * (8 + 2 * cb)          # pass-1 result + relayouts
              + C * OH * OW * (8 + 2 * ob)        # epilogue relayouts
              + OH * C * OW * 4)                  # accumulator scratch
    want = 2 * blocks + interm + (4 << 20)
    try:  # generation-aware cap: v7x has only 64 MiB VMEM per TensorCore
        cap = int(0.85 * pltpu.get_tpu_info().vmem_capacity_bytes)
    except Exception:
        cap = int(0.85 * (64 << 20))
    vmem_limit = int(min(max(want, 32 << 20), cap))
    # TODO(synk): add Wp (K) tiling for sources so wide that `want` exceeds cap.

    out_flat = pl.pallas_call(
        _resize_kernel,
        out_shape=jax.ShapeDtypeStruct((N, C, OH * OW), out_dtype),
        grid=(N, KT),
        in_specs=[
            pl.BlockSpec((None, C, TH, Wp), lambda n, k: (n, 0, k, 0)),
            pl.BlockSpec((None, OH, TH), lambda n, k: (n, 0, k)),
            pl.BlockSpec((None, Wp, OW), lambda n, k: (n, 0, 0)),
        ],
        out_specs=pl.BlockSpec((None, C, OH * OW), lambda n, k: (n, 0, 0)),
        scratch_shapes=[pltpu.VMEM((OH, C * OW), jnp.float32)],
        compiler_params=pltpu.CompilerParams(
            dimension_semantics=("parallel", "arbitrary"),
            vmem_limit_bytes=vmem_limit),
    )(x, wh, wwt)

    batch = out_flat.reshape(N, C, OH, OW)   # free metadata reshape (no transpose)
    return batch, original_sizes


if __name__ == "__main__":
    key = jax.random.PRNGKey(0)
    k0, k1, k2 = jax.random.split(key, 3)

    size = (16, 16)
    # two images with different spatial shapes (CHW), like the PyTorch list input
    img0 = jax.random.normal(k0, (4, 12, 20), dtype=jnp.float32)
    img1 = jax.random.normal(k1, (4, 24, 16), dtype=jnp.float32)
    imgs = [img0, img1]

    # default fast path: bf16 compute, f32 accumulate + f32 output
    batch, orig_sizes = resize_preprocessor(imgs, size)
    batch = jax.block_until_ready(batch)
    assert batch.shape == (2, 4, 16, 16), batch.shape
    assert batch.dtype == jnp.float32, batch.dtype
    assert orig_sizes == [(12, 20), (24, 16)], orig_sizes

    # f32 compute path: validates the math tightly against jax.image.resize
    batch_f32, _ = resize_preprocessor(imgs, size, compute_dtype=jnp.float32)
    batch_f32 = jax.block_until_ready(batch_f32)
    for i, img in enumerate(imgs):
        ref = jax.image.resize(img, (img.shape[0], size[0], size[1]),
                               method="linear", antialias=False)
        assert jnp.allclose(batch_f32[i], ref, atol=1e-4, rtol=1e-4), (
            f"f32 mismatch vs jax.image.resize for image {i}")
        assert jnp.allclose(batch[i], ref, atol=5e-2, rtol=5e-2), (
            f"bf16 mismatch vs jax.image.resize for image {i}")

    # multi-row-tile path (KT > 1): tall image with row_tile=128 -> Hp=256, 2 tiles
    img2 = jax.random.normal(k2, (3, 160, 200), dtype=jnp.float32)
    out2, orig2 = resize_preprocessor([img2], (32, 48),
                                      compute_dtype=jnp.float32, row_tile=128)
    out2 = jax.block_until_ready(out2)
    ref2 = jax.image.resize(img2, (3, 32, 48), method="linear", antialias=False)
    assert out2.shape == (1, 3, 32, 48), out2.shape
    assert orig2 == [(160, 200)], orig2
    assert jnp.allclose(out2[0], ref2, atol=1e-4, rtol=1e-4), (
        "row-tiled path mismatch vs jax.image.resize")

    # constant image must stay (approximately, under bf16 weights) constant
    const = jnp.full((3, 10, 14), 2.5, dtype=jnp.float32)
    const_out, _ = resize_preprocessor([const], size)
    const_out = jax.block_until_ready(const_out)
    assert jnp.allclose(const_out, 2.5, atol=5e-2)

    print("KERNEL_OK")
</pallas_src>

<mosaic_0001>
module attributes {stable_mosaic.version = 11 : i64} {
  func.func @_resize_kernel(%arg0: i32, %arg1: i32, %arg2: memref<1x4x32x128xbf16, #tpu.memory_space<vmem>>, %arg3: memref<1x16x32xbf16, #tpu.memory_space<vmem>>, %arg4: memref<1x128x16xbf16, #tpu.memory_space<vmem>>, %arg5: memref<1x4x256xf32, #tpu.memory_space<vmem>>, %arg6: memref<16x64xf32, #tpu.memory_space<vmem>>) attributes {dimension_semantics = [#tpu.dimension_semantics<parallel>, #tpu.dimension_semantics<arbitrary>], iteration_bounds = array<i64: 2, 1>, scalar_prefetch = 0 : i64, scratch_operands = 1 : i64, tpu.core_type = #tpu.core_type<tc>, window_params = [{transform_indices = @transform_0, window_bounds = array<i64: 1, 4, 32, 128>}, {transform_indices = @transform_1, window_bounds = array<i64: 1, 16, 32>}, {transform_indices = @transform_2, window_bounds = array<i64: 1, 128, 16>}, {transform_indices = @transform_3, window_bounds = array<i64: 1, 4, 256>}]} {
    %c0_i32 = arith.constant 0 : i32
    %0 = arith.cmpi eq, %arg1, %c0_i32 : i32
    %1 = arith.extui %0 : i1 to i32
    %c0_i32_0 = arith.constant 0 : i32
    %2 = arith.cmpi ne, %1, %c0_i32_0 : i32
    scf.if %2 {
      %cst_17 = arith.constant 0.000000e+00 : f32
      %22 = vector.broadcast %cst_17 : f32 to vector<16x64xf32>
      %c0_18 = arith.constant 0 : index
      %c0_19 = arith.constant 0 : index
      %23 = vector.load %arg6[%c0_18, %c0_19] : memref<16x64xf32, #tpu.memory_space<vmem>>, vector<16x64xf32>
      tpu.vector_store %arg6[%c0_18, %c0_19], %22 {strides = array<i32>} : memref<16x64xf32, #tpu.memory_space<vmem>>, vector<16x64xf32>,
    } else {
    }
    %c0 = arith.constant 0 : index
    %c0_1 = arith.constant 0 : index
    %c0_2 = arith.constant 0 : index
    %c0_3 = arith.constant 0 : index
    %3 = vector.load %arg2[%c0, %c0_1, %c0_2, %c0_3] : memref<1x4x32x128xbf16, #tpu.memory_space<vmem>>, vector<1x4x32x128xbf16>
    %4 = vector.shape_cast %3 : vector<1x4x32x128xbf16> to vector<4x32x128xbf16>
    %5 = vector.shape_cast %4 : vector<4x32x128xbf16> to vector<128x128xbf16>
    %c0_4 = arith.constant 0 : index
    %c0_5 = arith.constant 0 : index
    %c0_6 = arith.constant 0 : index
    %6 = vector.load %arg4[%c0_4, %c0_5, %c0_6] : memref<1x128x16xbf16, #tpu.memory_space<vmem>>, vector<1x128x16xbf16>
    %7 = vector.shape_cast %6 : vector<1x128x16xbf16> to vector<128x16xbf16>
    %cst = arith.constant dense<0.000000e+00> : vector<128x16xf32>
    %8 = tpu.matmul %5, %7, %cst {dimension_numbers = #tpu.dot_dimension_numbers<[1], [0], [0], [1], [0, 0, 1, 1], [], []>} : vector<128x128xbf16>, vector<128x16xbf16>, vector<128x16xf32> -> vector<128x16xf32>
    %9 = vector.shape_cast %8 : vector<128x16xf32> to vector<4x32x16xf32>
    %10 = tpu.transpose %9, [1, 0, 2] : vector<4x32x16xf32> -> vector<32x4x16xf32>
    %11 = vector.shape_cast %10 : vector<32x4x16xf32> to vector<32x64xf32>
    %12 = arith.truncf %11 : vector<32x64xf32> to vector<32x64xbf16>
    %c0_7 = arith.constant 0 : index
    %c0_8 = arith.constant 0 : index
    %13 = vector.load %arg6[%c0_7, %c0_8] : memref<16x64xf32, #tpu.memory_space<vmem>>, vector<16x64xf32>
    %c0_9 = arith.constant 0 : index
    %c0_10 = arith.constant 0 : index
    %c0_11 = arith.constant 0 : index
    %14 = vector.load %arg3[%c0_9, %c0_10, %c0_11] : memref<1x16x32xbf16, #tpu.memory_space<vmem>>, vector<1x16x32xbf16>
    %15 = vector.shape_cast %14 : vector<1x16x32xbf16> to vector<16x32xbf16>
    %cst_12 = arith.constant dense<0.000000e+00> : vector<16x64xf32>
    %16 = tpu.matmul %15, %12, %cst_12 {dimension_numbers = #tpu.dot_dimension_numbers<[1], [0], [0], [1], [0, 0, 1, 1], [], []>} : vector<16x32xbf16>, vector<32x64xbf16>, vector<16x64xf32> -> vector<16x64xf32>
    %17 = arith.addf %13, %16 : vector<16x64xf32>
    %c0_13 = arith.constant 0 : index
    %c0_14 = arith.constant 0 : index
    %18 = vector.load %arg6[%c0_13, %c0_14] : memref<16x64xf32, #tpu.memory_space<vmem>>, vector<16x64xf32>
    tpu.vector_store %arg6[%c0_13, %c0_14], %17 {strides = array<i32>} : memref<16x64xf32, #tpu.memory_space<vmem>>, vector<16x64xf32>,
    %c0_i32_15 = arith.constant 0 : i32
    %19 = arith.cmpi eq, %arg1, %c0_i32_15 : i32
    %20 = arith.extui %19 : i1 to i32
    %c0_i32_16 = arith.constant 0 : i32
    %21 = arith.cmpi ne, %20, %c0_i32_16 : i32
    scf.if %21 {
      %c0_17 = arith.constant 0 : index
      %c0_18 = arith.constant 0 : index
      %22 = vector.load %arg6[%c0_17, %c0_18] : memref<16x64xf32, #tpu.memory_space<vmem>>, vector<16x64xf32>
      %23 = vector.shape_cast %22 : vector<16x64xf32> to vector<16x4x16xf32>
      %24 = tpu.transpose %23, [1, 0, 2] : vector<16x4x16xf32> -> vector<4x16x16xf32>
      %25 = vector.shape_cast %24 : vector<4x16x16xf32> to vector<4x256xf32>
      %c0_19 = arith.constant 0 : index
      %c0_20 = arith.constant 0 : index
      %c0_21 = arith.constant 0 : index
      %26 = vector.load %arg5[%c0_19, %c0_20, %c0_21] : memref<1x4x256xf32, #tpu.memory_space<vmem>>, vector<1x4x256xf32>
      %27 = vector.shape_cast %26 : vector<1x4x256xf32> to vector<4x256xf32>
      %28 = vector.shape_cast %25 : vector<4x256xf32> to vector<1x4x256xf32>
      tpu.vector_store %arg5[%c0_19, %c0_20, %c0_21], %28 {strides = array<i32>} : memref<1x4x256xf32, #tpu.memory_space<vmem>>, vector<1x4x256xf32>,
    } else {
    }
    return
  }
  func.func @transform_0(%arg0: i32, %arg1: i32) -> (i32, i32, i32, i32) {
    %c0_i32 = arith.constant 0 : i32
    %c0_i32_0 = arith.constant 0 : i32
    %c0_i32_1 = arith.constant 0 : i32
    return %arg0, %c0_i32, %arg1, %c0_i32_0 : i32, i32, i32, i32
  }
  func.func @transform_1(%arg0: i32, %arg1: i32) -> (i32, i32, i32) {
    %c0_i32 = arith.constant 0 : i32
    %c0_i32_0 = arith.constant 0 : i32
    return %arg0, %c0_i32, %arg1 : i32, i32, i32
  }
  func.func @transform_2(%arg0: i32, %arg1: i32) -> (i32, i32, i32) {
    %c0_i32 = arith.constant 0 : i32
    %c0_i32_0 = arith.constant 0 : i32
    %c0_i32_1 = arith.constant 0 : i32
    return %arg0, %c0_i32, %c0_i32_0 : i32, i32, i32
  }
  func.func @transform_3(%arg0: i32, %arg1: i32) -> (i32, i32, i32) {
    %c0_i32 = arith.constant 0 : i32
    %c0_i32_0 = arith.constant 0 : i32
    %c0_i32_1 = arith.constant 0 : i32
    return %arg0, %c0_i32, %c0_i32_0 : i32, i32, i32
  }
}

</mosaic_0001>

<bundles_post_ra>
// kernel: tpu_custom_call.1
= control target key start
LH: loop header
LB: loop body
LE: loop exit
PB: predicated region body
PF: predicated region fallthrough
CT: control target
= control target key end

     0   :  { %8 = vsyncpa [#allocation4], 0  ;;  %s2517_s0 = inlined_call_operand.vmem [shape: bf16[2,4,32,128], index: 0, kind: input, shape index: {}]   ;;  %s2518_s1 = inlined_call_operand.vmem [shape: bf16[2,16,32], index: 1, kind: input, shape index: {}]   ;;  %s2519_s2 = inlined_call_operand.vmem [shape: bf16[2,128,16], index: 2, kind: input, shape index: {}]   ;;  %s2520_s3 = inlined_call_operand.hbm [shape: f32[2,4,256], index: 3, kind: output, shape index: {}]  }
   0x1   :  { %10 = vsyncpa [#allocation4 + $0x1], 0  ;;  %s2136_s12 = smov 0   ;;  %s2138_s13 = smov 0  }
   0x2   :  { %s2140_s14 = smov 0   ;;  %s2142_s15 = smov 0  }
   0x3   :  { %s2144_s16 = smov 0   ;;  %s2146_s17 = smov 0  }
   0x4 LB: > { %s1777_s18 = sadd.s32 4294967295, %s2102_s17   ;;  %s1778_s19 = sadd.s32 4294967294, %s2102_s17   ;;  %s2102_s17 = sphi %s2146_s17, %s16_s17   ;;  %s2098_s16 = sphi %s2144_s16, %s2527_s16   ;;  %s2094_s15 = sphi %s2142_s15, %s2526_s15   ;;  %s2090_s14 = sphi %s2140_s14, %s2525_s14   ;;  %s2086_s13 = sphi %s2138_s13, %s2524_s13   ;;  %s2082_s12 = sphi %s2136_s12, %s2523_s12  }
   0x5   : > { %s28_s20 = sadd.s32 1, %s2098_s16  ;;  %s117_s21 = sadd.s32 1, %s2090_s14 }
   0x6   : > { %p30_p0 = scmp.ge.s32.totalorder %s28_s20, 2  ;;  %p127_p1 = scmp.ne.s32.totalorder %s2090_s14, %s2086_s13 }
   0x7   : > { %p128_p2 = scmp.eq.s32.totalorder %s1777_s18, 1  ;;  %p133_p3 = scmp.ne.s32.totalorder %s2086_s13, %s2082_s12 }
   0x8   : > { %s2529_s20 = smov (%p30_p0, %s28_s20), 0  ;;  %p134_p5 = scmp.eq.s32.totalorder %s1778_s19, 1 }
   0x9   : > { %p2176_p4 = por %p128_p2, %p127_p1  ;;  %s114_s23 = ssub.s32 %s2098_s16, %s2529_s20 }
   0xa   : > { %p1781_p6 = scmp.ge.s32.totalorder %s2102_s17, 1  ;;  %p115_p7 = scmp.eq.s32.totalorder %s114_s23, 0 }
   0xb   : > { %p2183_p8 = por %p134_p5, %p133_p3  ;;  %p184_p9 = scmp.lt.s32.totalorder %s2102_s17, 3 }
   0xc   : > { %s2189_s25 = scalar_select %p115_p7, %s2090_s14, %s117_s21  }
   0xd   : > { %p185_p10 = pnand %p1781_p6, %p184_p9 }
   0xe   : > { %p226_p11 = scmp.lt.s32.totalorder (!%p185_p10), %s2094_s15, 1  ;;  %v2104_v24 = vmov (!%p185_p10), 1983009808   ;;  %v486_v26 = vlaneseq (!%p185_p10)  ;;  %v2105_v27 = vmov (!%p185_p10), 1934713408   ;;  %s2106_s7 = smov (!%p185_p10), 16  }
   0xf   : > { %188 = sbr.rel (%p185_p10) target bundleno = 981 (0x3d5), region = 32  ;;  %v484_v25 = vunpack.c.l.s4 (!%p185_p10), %v2104_v24  ;;  %v516_v28 = vunpack.c.l.s4 (!%p185_p10), %v2105_v27  ;;  %s2108_s9 = smov (!%p185_p10), 48   ;;  %vm2109_vm0 = vmmov (!%p185_p10), 0   ;;  %vm253_vm1 = vcmask (!%p185_p10), 523264  }
  0x10   : > { %v487_v31 = vshrl.u32 (!%p185_p10), %v486_v26, 7  ;;  %s2110_s19 = smov (!%p185_p10), 32   ;;  %vm1073_vm2 = vcmask (!%p185_p10), 130048   ;;  %vm1078_vm3 = vcmask (!%p185_p10), 261120   ;;  %vm1083_vm4 = vcmask (!%p185_p10), 392192   ;;  %s2111_s21 = smov (!%p185_p10), 112  }
  0x11   : > { %v485_v30 = vunpack.c.0.s8 (!%p185_p10), %v484_v25  ;;  %v517_v41 = vunpack.c.0.s8 (!%p185_p10), %v516_v28  ;;  %s2112_s23 = smov (!%p185_p10), 96   ;;  %s222_s28 = sand.u32 (!%p185_p10), 1, %s2086_s13   ;;  %vm1641_vm5 = vcmask (!%p185_p10), 654336   ;;  %vm1643_vm6 = vcmask (!%p185_p10), 785408  }
  0x12   : > { %s1782_s29 = sshll.u32 (!%p185_p10), %s222_s28, 3  ;;  %vm1645_vm7 = vcmask (!%p185_p10), 916480   ;;  %s2115_s10 = smov (!%p185_p10), [#allocation3]  }
  0x13   : > { %v2226_v42 = vsub.s32 (!%p185_p10), %v485_v30, %v487_v31  ;;  %v2228_v45 = vsub.s32 (!%p185_p10), %v517_v41, %v487_v31  ;;  %s224_s4 = scalar_lea.vmem (!%p185_p10), [#allocation3], %s1782_s29  ;;  %s2028_s11 = sshll.u32 (!%p185_p10), %s2115_s10, 4  ;;  %s2029_s11 = int_to_ptr.vmem [resolvable:$false] %s2028_s11 }
  0x14   : > { %s1674_s5 = sshll.u32 (!%p185_p10), %s224_s4, 4  ;;  %s2472_s5 = int_to_ptr.vmem [resolvable:$true] %s1674_s5 }
  0x15   : > { %p2031_p1 = scmp.lt.s32.totalorder (!%p185_p10), %s2472_s5, %s2029_s11 }
  0x16   : > { %s2193_s26 = scalar_select %p226_p11, %s2094_s15, 1 }
  0x18   : > { %s1832_s27 = sshll.u32 %s2193_s26, 6  ;;  %s1833_s8 = sshll.u32 %s2193_s26, 3 }
  0x19   : > { %s2199_s30 = scalar_lea.vmem %s2519_s2, %s1832_s27  ;;  %s2207_s6 = scalar_lea.vmem %s2517_s0, %s1832_s27 }
  0x1a   : > { %v2007_v0 = vld [vmem:[%s2199_s30] sm:$0xff]   ;;  %v2008_v1 = vld [vmem:[%s2199_s30 + $0x8] sm:$0xff]   ;;  %v2009_v2 = vld [vmem:[%s2199_s30 + $0x10] sm:$0xff]   ;;  %s2351_s18 = scalar_lea.vmem %s2518_s1, %s1833_s8  ;;  %s2113_s26 = smov 80  }
  0x1b   : > { %1855 = vmatprep.subr.bf16.mxu0 %v2007_v0  ;;  %1895 = vmatprep.subr.bf16.mxu1 %v2007_v0  ;;  %v2010_v3 = vld [vmem:[%s2199_s30 + $0x18] sm:$0xff]   ;;  %v2015_v4 = vld [vmem:[%s2207_s6] sm:$0xff]   ;;  %v2018_v5 = vld [vmem:[%s2207_s6 + $0x30] sm:$0xff]   ;;  %s2114_s27 = smov 64  }
  0x1c   : > { %1856 = vmatpush3.bf16.msra.mxu0 %v2007_v0  ;;  %1903 = vmatpush3.bf16.msra.mxu1 %v2007_v0  ;;  %v2011_v6 = vld [vmem:[%s2199_s30 + $0x20] sm:$0xff]   ;;  %v2012_v7 = vld [vmem:[%s2199_s30 + $0x28] sm:$0xff]   ;;  %v2013_v8 = vld [vmem:[%s2199_s30 + $0x30] sm:$0xff]  }
  0x1d   : > { %1857 = vmatprep.subr.bf16.mxu0 %v2008_v1  ;;  %1896 = vmatprep.subr.bf16.mxu1 %v2008_v1  ;;  %v2014_v9 = vld [vmem:[%s2199_s30 + $0x38] sm:$0xff]   ;;  %v2016_v10 = vld [vmem:[%s2207_s6 + $0x8] sm:$0xff]   ;;  %v2017_v12 = vld [vmem:[%s2207_s6 + $0x10] sm:$0xff]   ;;  %s1835_s30 = sshll.u32 %s2094_s15, 7  ;;  %s1660_s15 = scalar_lea.sflag [#allocation4], %s222_s28 }
  0x1e   : > { %1871 = vmatprep.mubr.bf16.mxu0 %v2015_v4  ;;  %1883 = vmatprep.mubr.bf16.mxu1 %v2018_v5  ;;  %v2020_v11 = vld [vmem:[%s2207_s6 + $0x38] sm:$0xff]   ;;  %v2021_v14 = vld [vmem:[%s2207_s6 + $0x20] sm:$0xff]   ;;  %v2022_v15 = vld [vmem:[%s2207_s6 + $0x28] sm:$0xff]   ;;  %s2470_s8 = scalar_lea.hbm %s2520_s3, %s1835_s30 }
  0x1f   : > { %v2019_v13 = vld [vmem:[%s2207_s6 + $0x18] sm:$0xff]  }
  0x20   : > { %1858 = vmatpush3.bf16.msra.mxu0 %v2008_v1  ;;  %1904 = vmatpush3.bf16.msra.mxu1 %v2008_v1 }
  0x21   : > { %1859 = vmatprep.subr.bf16.mxu0 %v2009_v2  ;;  %1897 = vmatprep.subr.bf16.mxu1 %v2009_v2 }
  0x24   : > { %1860 = vmatpush3.bf16.msra.mxu0 %v2009_v2  ;;  %1905 = vmatpush3.bf16.msra.mxu1 %v2009_v2 }
  0x25   : > { %1861 = vmatprep.subr.bf16.mxu0 %v2010_v3  ;;  %1898 = vmatprep.subr.bf16.mxu1 %v2010_v3 }
  0x28   : > { %1862 = vmatpush3.bf16.msra.mxu0 %v2010_v3  ;;  %1906 = vmatpush3.bf16.msra.mxu1 %v2010_v3 }
  0x29   : > { %1863 = vmatprep.subr.bf16.mxu0 %v2011_v6  ;;  %1899 = vmatprep.subr.bf16.mxu1 %v2011_v6 }
  0x2c   : > { %1864 = vmatpush3.bf16.msra.mxu0 %v2011_v6  ;;  %1907 = vmatpush3.bf16.msra.mxu1 %v2011_v6 }
  0x2d   : > { %1865 = vmatprep.subr.bf16.mxu0 %v2012_v7  ;;  %1900 = vmatprep.subr.bf16.mxu1 %v2012_v7 }
  0x30   : > { %1866 = vmatpush3.bf16.msra.mxu0 %v2012_v7  ;;  %1908 = vmatpush3.bf16.msra.mxu1 %v2012_v7 }
  0x31   : > { %1867 = vmatprep.subr.bf16.mxu0 %v2013_v8  ;;  %1901 = vmatprep.subr.bf16.mxu1 %v2013_v8 }
  0x34   : > { %1868 = vmatpush3.bf16.msra.mxu0 %v2013_v8  ;;  %1909 = vmatpush3.bf16.msra.mxu1 %v2013_v8 }
  0x35   : > { %1869 = vmatprep.subr.bf16.mxu0 %v2014_v9  ;;  %1902 = vmatprep.subr.bf16.mxu1 %v2014_v9 }
  0x38   : > { %1870 = vmatpush3.bf16.msra.mxu0 %v2014_v9  ;;  %1910 = vmatpush3.bf16.msra.mxu1 %v2014_v9 }
  0x3b   : > { %1872 = vmatmul.mubr.bf16.vlgmr.msra.gmra.mrb[0].mxu0 %v2016_v10  ;;  %1884 = vmatmul.mubr.bf16.vlgmr.msra.gmra.mrb[0].mxu1 %v2020_v11 }
  0x3c   : > { %1875 = vmatprep.mubr.bf16.mxu0 %v2017_v12 }
  0x43   : > { %1876 = vmatmul.mubr.bf16.gmra.mrb[4].mxu0 %v2019_v13 }
  0x44   : > { %1879 = vmatprep.mubr.bf16.mxu0 %v2021_v14 }
  0x4b   : > { %1880 = vmatmul.mubr.bf16.gmra.mrb[8].mxu0 %v2022_v15 }
 0x10e   : > { %v1873_v16 = vpop.f32.mrb[0].mxu0  ;;  %v1885_v17 = vpop.f32.mrb[0].mxu1 }
 0x10f   : > { %v418_v18 = vpop.f32.mrb[1].mxu0  ;;  %v466_v19 = vpop.f32.mrb[1].mxu1 }
 0x110   : > { %v2222_v20 = vpop.f32.mrb[2].mxu0  ;;  %v1886_v21 = vpop.f32.mrb[2].mxu1 }
 0x111   : > { %v2224_v22 = vpop.f32.mrb[3].mxu0  ;;  %v469_v23 = vpop.f32.mrb[3].mxu1 }
 0x116   : > { %v1877_v29 = vpop.f32.mrb[4].mxu0 }
 0x117   : > { %v633_v32 = vcombine.low %v1877_v29, %v1885_v17  ;;  %v634_v33 = vcombine.high %v1877_v29, %v1885_v17  ;;  %v434_v34 = vpop.f32.mrb[5].mxu0 }
 0x118   : > { %v497_v35 = vcombine.low %v434_v34, %v466_v19  ;;  %v498_v36 = vcombine.high %v434_v34, %v466_v19  ;;  %v1878_v37 = vpop.f32.mrb[6].mxu0 }
 0x119   : > { %v701_v38 = vcombine.low %v1878_v37, %v1886_v21  ;;  %v702_v39 = vcombine.high %v1878_v37, %v1886_v21  ;;  %v437_v40 = vpop.f32.mrb[7].mxu0  ;;  %v641_v46 = vrot.slane %v633_v32, %v2226_v42  ;;  %v648_v47 = vrot.slane %v634_v33, %v2226_v42 }
 0x11a   : > { %v565_v43 = vcombine.low %v437_v40, %v469_v23  ;;  %v566_v44 = vcombine.high %v437_v40, %v469_v23  ;;  %v505_v48 = vrot.slane %v497_v35, %v2226_v42  ;;  %v512_v49 = vrot.slane %v498_v36, %v2226_v42 }
 0x11b   : > { %v709_v51 = vrot.slane %v701_v38, %v2226_v42  ;;  %v716_v52 = vrot.slane %v702_v39, %v2226_v42 }
 0x11c   : > { %v573_v56 = vrot.slane %v565_v43, %v2226_v42  ;;  %v580_v57 = vrot.slane %v566_v44, %v2226_v42 }
 0x11e   : > { %v1881_v50 = vpop.f32.mrb[8].mxu0 }
 0x11f   : > { %v617_v53 = vcombine.low %v1873_v16, %v1881_v50  ;;  %v618_v54 = vcombine.high %v1873_v16, %v1881_v50  ;;  %v450_v55 = vpop.f32.mrb[9].mxu0 }
 0x120   : > { %v481_v58 = vcombine.low %v418_v18, %v450_v55  ;;  %v482_v59 = vcombine.high %v418_v18, %v450_v55  ;;  %v1882_v60 = vpop.f32.mrb[10].mxu0 }
 0x121   : > { %v625_v61 = vrot.slane %v617_v53, %v2226_v42  ;;  %v632_v62 = vrot.slane %v618_v54, %v2226_v42  ;;  %v685_v63 = vcombine.low %v2222_v20, %v1882_v60  ;;  %v686_v0 = vcombine.high %v2222_v20, %v1882_v60  ;;  %v453_v1 = vpop.f32.mrb[11].mxu0 }
 0x122   : > { %v489_v2 = vrot.slane %v481_v58, %v2226_v42  ;;  %v496_v3 = vrot.slane %v482_v59, %v2226_v42  ;;  %v549_v4 = vcombine.low %v2224_v22, %v453_v1  ;;  %v550_v5 = vcombine.high %v2224_v22, %v453_v1 }
 0x123   : > { %v649_v6 = vcombine.low %v625_v61, %v641_v46  ;;  %v650_v7 = vcombine.high %v625_v61, %v641_v46  ;;  %v665_v8 = vcombine.low %v632_v62, %v648_v47  ;;  %v666_v9 = vcombine.high %v632_v62, %v648_v47 }
 0x124   : > { %v513_v10 = vcombine.low %v489_v2, %v505_v48  ;;  %v514_v11 = vcombine.high %v489_v2, %v505_v48  ;;  %v529_v12 = vcombine.low %v496_v3, %v512_v49  ;;  %v530_v13 = vcombine.high %v496_v3, %v512_v49 }
 0x125   : > { %v657_v14 = vrot.slane %v649_v6, %v2228_v45  ;;  %v664_v15 = vrot.slane %v650_v7, %v2228_v45  ;;  %v673_v16 = vrot.slane %v665_v8, %v2228_v45  ;;  %v680_v17 = vrot.slane %v666_v9, %v2228_v45 }
 0x126   : > { %v521_v18 = vrot.slane %v513_v10, %v2228_v45  ;;  %v528_v19 = vrot.slane %v514_v11, %v2228_v45  ;;  %v537_v20 = vrot.slane %v529_v12, %v2228_v45  ;;  %v544_v21 = vrot.slane %v530_v13, %v2228_v45 }
 0x127   : > { %v889_v22 = vcombine.low %v657_v14, %v664_v15  ;;  %v1809_v23 = vcombine.high %v657_v14, %v664_v15  ;;  %v905_v24 = vcombine.low %v673_v16, %v680_v17  ;;  %v1810_v25 = vcombine.high %v673_v16, %v680_v17 }
 0x128   : > { %v753_v26 = vcombine.low %v521_v18, %v528_v19  ;;  %v1805_v27 = vcombine.high %v521_v18, %v528_v19  ;;  %v769_v28 = vcombine.low %v537_v20, %v544_v21  ;;  %v1806_v29 = vcombine.high %v537_v20, %v544_v21 }
 0x129   : > { %v693_v30 = vrot.slane %v685_v63, %v2226_v42  ;;  %v700_v31 = vrot.slane %v686_v0, %v2226_v42  ;;  %v557_v32 = vrot.slane %v549_v4, %v2226_v42  ;;  %v564_v33 = vrot.slane %v550_v5, %v2226_v42 }
 0x12a   : > { %v2259_v34 = vrot.slane %v889_v22, %v2226_v42  ;;  %v2262_v35 = vrot.slane %v1809_v23, %v2226_v42  ;;  %v2265_v36 = vrot.slane %v905_v24, %v2226_v42  ;;  %v2268_v37 = vrot.slane %v1810_v25, %v2226_v42 }
 0x12b   : > { %v717_v38 = vcombine.low %v693_v30, %v709_v51  ;;  %v718_v39 = vcombine.high %v693_v30, %v709_v51  ;;  %v733_v40 = vcombine.low %v700_v31, %v716_v52  ;;  %v734_v41 = vcombine.high %v700_v31, %v716_v52 }
 0x12c   : > { %v581_v43 = vcombine.low %v557_v32, %v573_v56  ;;  %v582_v44 = vcombine.high %v557_v32, %v573_v56  ;;  %v597_v46 = vcombine.low %v564_v33, %v580_v57  ;;  %v598_v47 = vcombine.high %v564_v33, %v580_v57 }
 0x12d   : > { %v725_v48 = vrot.slane %v717_v38, %v2228_v45  ;;  %v732_v49 = vrot.slane %v718_v39, %v2228_v45  ;;  %v741_v50 = vrot.slane %v733_v40, %v2228_v45  ;;  %v748_v53 = vrot.slane %v734_v41, %v2228_v45 }
 0x12e   : > { %v589_v54 = vrot.slane %v581_v43, %v2228_v45  ;;  %v596_v55 = vrot.slane %v582_v44, %v2228_v45  ;;  %v605_v51 = vrot.slane %v597_v46, %v2228_v45  ;;  %v612_v52 = vrot.slane %v598_v47, %v2228_v45 }
 0x12f   : > { %v957_v58 = vcombine.low %v725_v48, %v732_v49  ;;  %v1811_v56 = vcombine.high %v725_v48, %v732_v49  ;;  %v973_v59 = vcombine.low %v741_v50, %v748_v53  ;;  %v1812_v57 = vcombine.high %v741_v50, %v748_v53 }
 0x130   : > { %v821_v60 = vcombine.low %v589_v54, %v596_v55  ;;  %v1807_v61 = vcombine.high %v589_v54, %v596_v55  ;;  %v837_v62 = vcombine.low %v605_v51, %v612_v52  ;;  %v1808_v63 = vcombine.high %v605_v51, %v612_v52 }
 0x131   : > { %v921_v0 = vcombine.low %v2259_v34, %v2262_v35  ;;  %v937_v1 = vcombine.low %v2265_v36, %v2268_v37  ;;  %v964_v2 = vrot.slane %v957_v58, %v2226_v42  ;;  %v972_v3 = vrot.slane %v1811_v56, %v2226_v42 }
 0x132   : > { %v980_v4 = vrot.slane %v973_v59, %v2226_v42  ;;  %v988_v5 = vrot.slane %v1812_v57, %v2226_v42  ;;  %v760_v6 = vrot.slane %v753_v26, %v2226_v42  ;;  %v768_v7 = vrot.slane %v1805_v27, %v2226_v42 }
 0x133   : > { %v2289_v8 = vrot.slane %v921_v0, %v2228_v45  ;;  %v2292_v9 = vrot.slane %v937_v1, %v2228_v45  ;;  %v989_v10 = vcombine.low %v964_v2, %v972_v3  ;;  %v776_v11 = vrot.slane %v769_v28, %v2226_v42 }
 0x134   : > { %v1005_v12 = vcombine.low %v980_v4, %v988_v5  ;;  %v784_v13 = vrot.slane %v1806_v29, %v2226_v42  ;;  %v785_v14 = vcombine.low %v760_v6, %v768_v7  ;;  %v828_v15 = vrot.slane %v821_v60, %v2226_v42 }
 0x135   : > { %v953_v16 = vcombine.low %v2289_v8, %v2292_v9  ;;  %v954_v17 = vcombine.high %v2289_v8, %v2292_v9  ;;  %v2302_v18 = vrot.slane %v989_v10, %v2228_v45  ;;  %v836_v19 = vrot.slane %v1807_v61, %v2226_v42 }
 0x136   : > { %v2306_v20 = vrot.slane %v1005_v12, %v2228_v45  ;;  %v2309_v21 = vrot.slane %v785_v14, %v2228_v45  ;;  %v801_v22 = vcombine.low %v776_v11, %v784_v13  ;;  %v844_v23 = vrot.slane %v837_v62, %v2226_v42 }
 0x137   : > { %v852_v24 = vrot.slane %v1808_v63, %v2226_v42  ;;  %v853_v25 = vcombine.low %v828_v15, %v836_v19  ;;  %v786_v26 = vcombine.high %v760_v6, %v768_v7  ;;  %v802_v27 = vcombine.high %v776_v11, %v784_v13 }
 0x138   : > { %v1022_v28 = vcombine.high %v2302_v18, %v2306_v20  ;;  %v1021_v29 = vcombine.low %v2302_v18, %v2306_v20  ;;  %v2318_v30 = vrot.slane %v801_v22, %v2228_v45  ;;  %v854_v31 = vcombine.high %v828_v15, %v836_v19 }
 0x139   : > { %v2321_v32 = vrot.slane %v853_v25, %v2228_v45  ;;  %v869_v33 = vcombine.low %v844_v23, %v852_v24  ;;  %v800_v38 = vrot.slane %v786_v26, %v2228_v45  ;;  %v816_v39 = vrot.slane %v802_v27, %v2228_v45 }
 0x13a   : > { %v1977_v40 = vpack.i.bf16 %v1022_v28, %v954_v17  ;;  %v817_v41 = vcombine.low %v2309_v21, %v2318_v30  ;;  %v818_v43 = vcombine.high %v2309_v21, %v2318_v30  ;;  %v868_v44 = vrot.slane %v854_v31, %v2228_v45 }
 0x13b   : > { %v877_v46 = vrot.slane %v869_v33, %v2228_v45  ;;  %v820_v47 = vcombine.high %v800_v38, %v816_v39  ;;  %v870_v48 = vcombine.high %v844_v23, %v852_v24  ;;  %v819_v49 = vcombine.low %v800_v38, %v816_v39 }
 0x13c   : > { %1978 = vrot.lane.b32.xlu1 %v1977_v40, %s2106_s7  ;;  %v922_v50 = vcombine.high %v2259_v34, %v2262_v35  ;;  %v938_v53 = vcombine.high %v2265_v36, %v2268_v37  ;;  %v990_v54 = vcombine.high %v964_v2, %v972_v3  ;;  %v1006_v55 = vcombine.high %v980_v4, %v988_v5 }
 0x13d   : > { %v886_v51 = vcombine.high %v2321_v32, %v877_v46  ;;  %v885_v52 = vcombine.low %v2321_v32, %v877_v46  ;;  %v884_v58 = vrot.slane %v870_v48, %v2228_v45  ;;  %v2107_v0 = vmov 0.0  }
 0x13e   : > { %v936_v56 = vrot.slane %v922_v50, %v2228_v45  ;;  %v952_v59 = vrot.slane %v938_v53, %v2228_v45  ;;  %v1004_v57 = vrot.slane %v990_v54, %v2228_v45  ;;  %v1020_v34 = vrot.slane %v1006_v55, %v2228_v45  ;;  %1887 = vmatprep.subr.bf16.mxu1 %v2107_v0 }
 0x13f   : > { %v1982_v35 = vpack.i.bf16 %v886_v51, %v818_v43  ;;  %v888_v60 = vcombine.high %v868_v44, %v884_v58  ;;  %v887_v36 = vcombine.low %v868_v44, %v884_v58  ;;  %1891 = vmatprep.mubr.msk.bf16.mxu1 %vm2109_vm0, %v2107_v0  ;;  %254 = vst.msk [vmem:[#allocation2] sm:$0xff] %vm253_vm1, %v2107_v0  ;;  %255 = vst.msk [vmem:[#allocation2 + $0x8] sm:$0xff] %vm253_vm1, %v2107_v0 }
 0x140   : > { %v956_v37 = vcombine.high %v936_v56, %v952_v59  ;;  %v1024_v61 = vcombine.high %v1004_v57, %v1020_v34  ;;  %v955_v62 = vcombine.low %v936_v56, %v952_v59  ;;  %v1023_v63 = vcombine.low %v1004_v57, %v1020_v34 }
 0x141   : > { %1983 = vrot.lane.b32.xlu0 %v1982_v35, %s2106_s7  ;;  %v1997_v1 = vpack.i.bf16 %v888_v60, %v820_v47  ;;  %v1987_v2 = vpack.i.bf16 %v887_v36, %v819_v49 }
 0x142   : > { %v2002_v3 = vpack.i.bf16 %v1024_v61, %v956_v37  ;;  %v1992_v4 = vpack.i.bf16 %v1023_v63, %v955_v62 }
 0x143   : > { %1998 = vrot.lane.b32.xlu1 %v1997_v1, %s2108_s9 }
 0x145   : > { %1988 = vrot.lane.b32.xlu0 %v1987_v2, %s2110_s19 }
 0x146   : > { %v1090_v18 = vld [vmem:[#allocation2] sm:$0xff] }
 0x147   : > { %2003 = vrot.lane.b32.xlu1 %v2002_v3, %s2108_s9 }
 0x149   : > { %1993 = vrot.lane.b32.xlu0 %v1992_v4, %s2110_s19 }
 0x1ae   : > { %v1979_v5 = vpop.permute.xlu1 %1978 }
 0x1af   : > { %v1981_v13 = vunpack.i.h.bf16 %v1979_v5  ;;  %v1980_v14 = vunpack.i.l.bf16 %v1979_v5 }
 0x1b1   : > { %v1076_v38 = vsel %vm1073_vm2, %v953_v16, %v1980_v14  ;;  %v1077_v39 = vsel %vm1073_vm2, %v1021_v29, %v1981_v13  ;;  %v2023_v16 = vld [vmem:[%s2351_s18] sm:$0xff]   ;;  %v1091_v29 = vld [vmem:[#allocation2 + $0x8] sm:$0xff]  ;;  %s2030_s18 = scalar_lea.vmem %s2029_s11, 256 }
 0x1b3   : > { %v1984_v6 = vpop.permute.xlu0 %1983 }
 0x1b4   : > { %v1986_v7 = vunpack.i.h.bf16 %v1984_v6  ;;  %v1985_v10 = vunpack.i.l.bf16 %v1984_v6 }
 0x1b5   : > { %v1999_v11 = vpop.permute.xlu1 %1998 }
 0x1b6   : > { %v1074_v19 = vsel %vm1073_vm2, %v817_v41, %v1985_v10  ;;  %v1075_v21 = vsel %vm1073_vm2, %v885_v52, %v1986_v7  ;;  %v2001_v22 = vunpack.i.h.bf16 %v1999_v11  ;;  %v2000_v23 = vunpack.i.l.bf16 %v1999_v11 }
 0x1b7   : > { %v1989_v12 = vpop.permute.xlu0 %1988 }
 0x1b8   : > { %v1991_v15 = vunpack.i.h.bf16 %v1989_v12  ;;  %v1990_v17 = vunpack.i.l.bf16 %v1989_v12 }
 0x1b9   : > { %v2004_v26 = vpop.permute.xlu1 %2003 }
 0x1ba   : > { %v1079_v24 = vsel %vm1078_vm3, %v1074_v19, %v1990_v17  ;;  %v1080_v25 = vsel %vm1078_vm3, %v1075_v21, %v1991_v15  ;;  %v2006_v40 = vunpack.i.h.bf16 %v2004_v26  ;;  %v2005_v41 = vunpack.i.l.bf16 %v2004_v26 }
 0x1bb   : > { %v1994_v27 = vpop.permute.xlu0 %1993  ;;  %v1084_v28 = vsel %vm1083_vm4, %v1079_v24, %v2000_v23  ;;  %v1085_v30 = vsel %vm1083_vm4, %v1080_v25, %v2001_v22 }
 0x1bc   : > { %v1996_v31 = vunpack.i.h.bf16 %v1994_v27  ;;  %v1995_v32 = vunpack.i.l.bf16 %v1994_v27  ;;  %v1088_v33 = vpack.c.bf16 %v1085_v30, %v1084_v28 }
 0x1be   : > { %v1082_v43 = vsel %vm1078_vm3, %v1077_v39, %v1996_v31  ;;  %v1081_v44 = vsel %vm1078_vm3, %v1076_v38, %v1995_v32  ;;  %1888 = vmatpush3.bf16.msra.mxu1 %v1088_v33 }
 0x1bf   : > { %1889 = vmatprep.subr.bf16.mxu1 %v2107_v0  ;;  %v1086_v46 = vsel %vm1083_vm4, %v1081_v44, %v2005_v41  ;;  %v1087_v8 = vsel %vm1083_vm4, %v1082_v43, %v2006_v40 }
 0x1c0   : > { %v1089_v9 = vpack.c.bf16 %v1087_v8, %v1086_v46 }
 0x1c2   : > { %1890 = vmatpush3.bf16.msra.mxu1 %v1089_v9 }
 0x1c5   : > { %1892 = vmatmul.mubr.msk.bf16.vlgmr.msra.gmra.mrb[4].mxu1 %vm1078_vm3, %v2023_v16 }
 0x298   : > { %v1136_v20 = vpop.f32.mrb[4].mxu1 }
 0x299   : > { %v1143_v47 = vadd.f32 %v1136_v20, %v1090_v18  ;;  %v1893_v48 = vpop.f32.mrb[5].mxu1 }
 0x29a   : > { %v1139_v49 = vpop.f32.mrb[6].mxu1 }
 0x29b   : > { %1146 = vst.msk [vmem:[#allocation2] sm:$0xff] %vm253_vm1, %v1143_v47  ;;  %v1144_v50 = vadd.f32 %v1139_v49, %v1091_v29  ;;  %v1894_v53 = vpop.f32.mrb[7].mxu1 }
 0x29d   : > { %1147 = vst.msk [vmem:[#allocation2 + $0x8] sm:$0xff] %vm253_vm1, %v1144_v50 }
 0x2a2   : > { %v1151_v54 = vld [vmem:[#allocation2] sm:$0xff] }
 0x2a3   : > { %1155 = vrot.lane.b32.xlu0 %v1151_v54, %s2111_s21 }
 0x2a4   : > { %v1152_v55 = vld [vmem:[#allocation2 + $0x8] sm:$0xff] }
 0x2a5   : > { %1157 = vrot.lane.b32.xlu1 %v1152_v55, %s2111_s21 }
 0x2a7   : > { %1161 = vrot.lane.b32.xlu0 %v1151_v54, %s2112_s23 }
 0x2a9   : > { %1163 = vrot.lane.b32.xlu1 %v1152_v55, %s2112_s23 }
 0x2ab   : > { %1167 = vrot.lane.b32.xlu0 %v1151_v54, %s2113_s26 }
 0x2ad   : > { %1169 = vrot.lane.b32.xlu1 %v1152_v55, %s2113_s26 }
 0x315   : > { %v1156_v51 = vpop.permute.xlu0 %1155 }
 0x317   : > { %v1158_v52 = vpop.permute.xlu1 %1157 }
 0x319   : > { %v1162_v58 = vpop.permute.xlu0 %1161 }
 0x31a   : > { %v1173_v56 = vcombine.low %v1151_v54, %v1162_v58  ;;  %v1174_v59 = vcombine.high %v1151_v54, %v1162_v58 }
 0x31b   : > { %v1164_v57 = vpop.permute.xlu1 %1163 }
 0x31c   : > { %v1181_v36 = vrot.slane %v1173_v56, %v2226_v42  ;;  %v1188_v37 = vrot.slane %v1174_v59, %v2226_v42  ;;  %v1241_v61 = vcombine.low %v1152_v55, %v1164_v57  ;;  %v1242_v62 = vcombine.high %v1152_v55, %v1164_v57 }
 0x31d   : > { %v1168_v34 = vpop.permute.xlu0 %1167 }
 0x31e   : > { %v1189_v35 = vcombine.low %v1156_v51, %v1168_v34  ;;  %v1190_v60 = vcombine.high %v1156_v51, %v1168_v34  ;;  %v1249_v11 = vrot.slane %v1241_v61, %v2226_v42  ;;  %v1256_v12 = vrot.slane %v1242_v62, %v2226_v42 }
 0x31f   : > { %v1170_v63 = vpop.permute.xlu1 %1169 }
 0x320   : > { %v1197_v1 = vrot.slane %v1189_v35, %v2226_v42  ;;  %v1204_v2 = vrot.slane %v1190_v60, %v2226_v42  ;;  %v1257_v3 = vcombine.low %v1158_v52, %v1170_v63  ;;  %v1258_v4 = vcombine.high %v1158_v52, %v1170_v63 }
 0x322   : > { %v1205_v5 = vcombine.low %v1181_v36, %v1197_v1  ;;  %v1206_v6 = vcombine.high %v1181_v36, %v1197_v1  ;;  %v1221_v7 = vcombine.low %v1188_v37, %v1204_v2  ;;  %v1222_v10 = vcombine.high %v1188_v37, %v1204_v2 }
 0x323   : > { %v1265_v13 = vrot.slane %v1257_v3, %v2226_v42  ;;  %v1272_v14 = vrot.slane %v1258_v4, %v2226_v42 }
 0x324   : > { %v1213_v15 = vrot.slane %v1205_v5, %v2228_v45  ;;  %v1220_v17 = vrot.slane %v1206_v6, %v2228_v45  ;;  %v1229_v19 = vrot.slane %v1221_v7, %v2228_v45  ;;  %v1236_v21 = vrot.slane %v1222_v10, %v2228_v45 }
 0x325   : > { %v1273_v22 = vcombine.low %v1249_v11, %v1265_v13  ;;  %v1274_v23 = vcombine.high %v1249_v11, %v1265_v13  ;;  %v1289_v24 = vcombine.low %v1256_v12, %v1272_v14  ;;  %v1290_v25 = vcombine.high %v1256_v12, %v1272_v14 }
 0x326   : > { %v1309_v26 = vcombine.low %v1213_v15, %v1220_v17  ;;  %v1815_v27 = vcombine.high %v1213_v15, %v1220_v17  ;;  %v1325_v28 = vcombine.low %v1229_v19, %v1236_v21  ;;  %v1816_v30 = vcombine.high %v1229_v19, %v1236_v21 }
 0x327   : > { %v1281_v31 = vrot.slane %v1273_v22, %v2228_v45  ;;  %v1288_v32 = vrot.slane %v1274_v23, %v2228_v45  ;;  %v1297_v33 = vrot.slane %v1289_v24, %v2228_v45  ;;  %v1304_v38 = vrot.slane %v1290_v25, %v2228_v45 }
 0x328   : > { %v1316_v39 = vrot.slane %v1309_v26, %v2226_v42  ;;  %v1324_v40 = vrot.slane %v1815_v27, %v2226_v42  ;;  %v1332_v41 = vrot.slane %v1325_v28, %v2226_v42  ;;  %v1340_v43 = vrot.slane %v1816_v30, %v2226_v42 }
 0x329   : > { %v1377_v44 = vcombine.low %v1281_v31, %v1288_v32  ;;  %v1817_v46 = vcombine.high %v1281_v31, %v1288_v32  ;;  %v1393_v8 = vcombine.low %v1297_v33, %v1304_v38  ;;  %v1818_v9 = vcombine.high %v1297_v33, %v1304_v38 }
 0x32a   : > { %v1341_v16 = vcombine.low %v1316_v39, %v1324_v40  ;;  %v1342_v18 = vcombine.high %v1316_v39, %v1324_v40  ;;  %v1357_v20 = vcombine.low %v1332_v41, %v1340_v43  ;;  %v1358_v29 = vcombine.high %v1332_v41, %v1340_v43 }
 0x32b   : > { %v1384_v47 = vrot.slane %v1377_v44, %v2226_v42  ;;  %v1392_v48 = vrot.slane %v1817_v46, %v2226_v42  ;;  %v1400_v49 = vrot.slane %v1393_v8, %v2226_v42  ;;  %v1408_v50 = vrot.slane %v1818_v9, %v2226_v42 }
 0x32c   : > { %v1349_v53 = vrot.slane %v1341_v16, %v2228_v45  ;;  %v1356_v54 = vrot.slane %v1342_v18, %v2228_v45  ;;  %v1365_v55 = vrot.slane %v1357_v20, %v2228_v45  ;;  %v1372_v51 = vrot.slane %v1358_v29, %v2228_v45 }
 0x32d   : > { %v1409_v52 = vcombine.low %v1384_v47, %v1392_v48  ;;  %v1410_v58 = vcombine.high %v1384_v47, %v1392_v48  ;;  %v1425_v56 = vcombine.low %v1400_v49, %v1408_v50  ;;  %v1426_v59 = vcombine.high %v1400_v49, %v1408_v50 }
 0x32e   : > { %v1819_v57 = vcombine.low %v1349_v53, %v1356_v54  ;;  %v1821_v34 = vcombine.high %v1349_v53, %v1356_v54  ;;  %v1820_v35 = vcombine.low %v1365_v55, %v1372_v51  ;;  %v1822_v60 = vcombine.high %v1365_v55, %v1372_v51 }
 0x32f   : > { %v1417_v36 = vrot.slane %v1409_v52, %v2228_v45  ;;  %v1424_v37 = vrot.slane %v1410_v58, %v2228_v45  ;;  %v1433_v61 = vrot.slane %v1425_v56, %v2228_v45  ;;  %v1440_v62 = vrot.slane %v1426_v59, %v2228_v45 }
 0x330   : > { %v1453_v63 = vrot.slane %v1819_v57, %v2226_v42  ;;  %v1469_v1 = vrot.slane %v1821_v34, %v2226_v42  ;;  %v1460_v2 = vrot.slane %v1820_v35, %v2226_v42  ;;  %v1476_v3 = vrot.slane %v1822_v60, %v2226_v42 }
 0x331   : > { %v1823_v4 = vcombine.low %v1417_v36, %v1424_v37  ;;  %v1825_v5 = vcombine.high %v1417_v36, %v1424_v37  ;;  %v1824_v6 = vcombine.low %v1433_v61, %v1440_v62  ;;  %v1826_v7 = vcombine.high %v1433_v61, %v1440_v62 }
 0x332   : > { %v1478_v10 = vcombine.high %v1453_v63, %v1469_v1  ;;  %v1493_v17 = vcombine.low %v1460_v2, %v1476_v3  ;;  %v1494_v24 = vcombine.high %v1460_v2, %v1476_v3  ;;  %v1477_v25 = vcombine.low %v1453_v63, %v1469_v1 }
 0x333   : > { %v1521_v11 = vrot.slane %v1823_v4, %v2226_v42  ;;  %v1537_v12 = vrot.slane %v1825_v5, %v2226_v42  ;;  %v1528_v13 = vrot.slane %v1824_v6, %v2226_v42  ;;  %v1544_v14 = vrot.slane %v1826_v7, %v2226_v42 }
 0x334   : > { %v1492_v15 = vrot.slane %v1478_v10, %v2228_v45  ;;  %v1501_v23 = vrot.slane %v1493_v17, %v2228_v45  ;;  %v1508_v28 = vrot.slane %v1494_v24, %v2228_v45  ;;  %v1485_v30 = vrot.slane %v1477_v25, %v2228_v45 }
 0x335   : > { %v1546_v19 = vcombine.high %v1521_v11, %v1537_v12  ;;  %v1561_v22 = vcombine.low %v1528_v13, %v1544_v14  ;;  %v1562_v42 = vcombine.high %v1528_v13, %v1544_v14  ;;  %v1545_v27 = vcombine.low %v1521_v11, %v1537_v12 }
 0x336   : > { %1586 = vrot.lane.b32.xlu0 %v1492_v15, %s2110_s19  ;;  %v1509_v33 = vcombine.high %v1485_v30, %v2107_v0  ;;  %v1510_v39 = vcombine.high %v1492_v15, %v2107_v0  ;;  %v1511_v41 = vcombine.high %v1501_v23, %v2107_v0  ;;  %v1512_v43 = vcombine.high %v1508_v28, %v2107_v0 }
 0x337   : > { %v1560_v21 = vrot.slane %v1546_v19, %v2228_v45  ;;  %v1569_v26 = vrot.slane %v1561_v22, %v2228_v45  ;;  %v1576_v31 = vrot.slane %v1562_v42, %v2228_v45  ;;  %v1553_v32 = vrot.slane %v1545_v27, %v2228_v45 }
 0x339   : > { %1614 = vrot.lane.b32.xlu1 %v1560_v21, %s2110_s19  ;;  %v1577_v38 = vcombine.high %v1553_v32, %v2107_v0  ;;  %v1578_v40 = vcombine.high %v1560_v21, %v2107_v0  ;;  %v1579_v45 = vcombine.high %v1569_v26, %v2107_v0  ;;  %v1580_v44 = vcombine.high %v1576_v31, %v2107_v0 }
 0x33a   : > { %1594 = vrot.lane.b32.xlu0 %v1501_v23, %s2114_s27 }
 0x33d   : > { %1622 = vrot.lane.b32.xlu1 %v1569_v26, %s2114_s27 }
 0x33e   : > { %1602 = vrot.lane.b32.xlu0 %v1508_v28, %s2112_s23 }
 0x341   : > { %1630 = vrot.lane.b32.xlu1 %v1576_v31, %s2112_s23 }
 0x342   : > { %1582 = vrot.lane.b32.xlu0 %v1509_v33, %s2106_s7 }
 0x345   : > { %1610 = vrot.lane.b32.xlu1 %v1577_v38, %s2106_s7 }
 0x346   : > { %1590 = vrot.lane.b32.xlu0 %v1510_v39, %s2108_s9 }
 0x349   : > { %1618 = vrot.lane.b32.xlu1 %v1578_v40, %s2108_s9  ;;  %s2024_s9 = scalar_lea.vmem %s2472_s5, 128 }
 0x34a   : > { %1598 = vrot.lane.b32.xlu0 %v1511_v41, %s2113_s26  ;;  %p2025_p12 = scmp.ne.s32.totalorder %s2472_s5, %s2024_s9  ;;  %p2032_p2 = scmp.lt.s32.totalorder %s2030_s18, %s2024_s9 }
 0x34c   : > { %p2026_p13 = pnand %p2025_p12, %p2176_p4  ;;  %p2033_p3 = por %p2032_p2, %p2031_p1 }
 0x34d   : > { %1626 = vrot.lane.b32.xlu1 %v1579_v45, %s2113_s26 }
 0x34e   : > { %1606 = vrot.lane.b32.xlu0 %v1512_v43, %s2111_s21  ;;  %p2027_p0 = pneg %p2026_p13 }
 0x350   : > { %p2034_p5 = pnand %p2033_p3, %p2027_p0 }
 0x351   : > { %1634 = vrot.lane.b32.xlu1 %v1580_v44, %s2111_s21 }
 0x3a8   : > { %v1587_v46 = vpop.permute.xlu0 %1586 }
 0x3ab   : > { %v1615_v8 = vpop.permute.xlu1 %1614 }
 0x3ac   : > { %v1595_v9 = vpop.permute.xlu0 %1594 }
 0x3af   : > { %v1623_v16 = vpop.permute.xlu1 %1622 }
 0x3b0   : > { %v1603_v18 = vpop.permute.xlu0 %1602 }
 0x3b3   : > { %v1631_v20 = vpop.permute.xlu1 %1630 }
 0x3b4   : > { %v1583_v29 = vpop.permute.xlu0 %1582 }
 0x3b5   : > { %v1637_v48 = vsel %vm1073_vm2, %v1485_v30, %v1583_v29 }
 0x3b6   : > { %v1638_v53 = vsel %vm1078_vm3, %v1637_v48, %v1587_v46 }
 0x3b7   : > { %v1611_v47 = vpop.permute.xlu1 %1610 }
 0x3b8   : > { %v1647_v49 = vsel %vm1073_vm2, %v1553_v32, %v1611_v47  ;;  %v1591_v50 = vpop.permute.xlu0 %1590 }
 0x3b9   : > { %v1648_v0 = vsel %vm1078_vm3, %v1647_v49, %v1615_v8  ;;  %v1639_v55 = vsel %vm1083_vm4, %v1638_v53, %v1591_v50 }
 0x3ba   : > { %v1640_v58 = vsel %vm253_vm1, %v1639_v55, %v1595_v9 }
 0x3bb   : > { %v1619_v54 = vpop.permute.xlu1 %1618 }
 0x3bc   : > { %v1649_v51 = vsel %vm1083_vm4, %v1648_v0, %v1619_v54  ;;  %v1599_v52 = vpop.permute.xlu0 %1598 }
 0x3bd   : > { %v1650_v56 = vsel %vm253_vm1, %v1649_v51, %v1623_v16  ;;  %v1642_v57 = vsel %vm1641_vm5, %v1640_v58, %v1599_v52 }
 0x3be   : > { %v1644_v60 = vsel %vm1643_vm6, %v1642_v57, %v1603_v18 }
 0x3bf   : > { %v1627_v59 = vpop.permute.xlu1 %1626 }
 0x3c0   : > { %v1651_v34 = vsel %vm1641_vm5, %v1650_v56, %v1627_v59  ;;  %v1607_v35 = vpop.permute.xlu0 %1606 }
 0x3c1   : > { %v1652_v36 = vsel %vm1643_vm6, %v1651_v34, %v1631_v20  ;;  %v1646_v61 = vsel %vm1645_vm7, %v1644_v60, %v1607_v35 }
 0x3c3   : > { %v1635_v37 = vpop.permute.xlu1 %1634 }
 0x3c4   : > { %v1653_v62 = vsel %vm1645_vm7, %v1652_v36, %v1635_v37 }
 0x3c5   : > { %v1656_v63 = vcombine.low %v1646_v61, %v1653_v62 }
 0x3c7   : > { %1658 = vst [vmem:[%s224_s4] sm:$0xff] %v1656_v63 }
 0x3c8   : > { %2037 = shalt.err (!%p2034_p5)
}
 0x3c9   : > { %s2038_s19 = scalar_lea.hbm %s2470_s8, 128  ;;  %s2042_s26 = scalar_lea.hbm %s2520_s3, 256 }
 0x3ca   : > { %p2039_p6 = scmp.ne.s32.totalorder %s2470_s8, %s2038_s19  ;;  %p2043_p10 = scmp.lt.u32.totalorder %s2470_s8, %s2520_s3 }
 0x3cb   : > { %p2044_p11 = scmp.lt.u32.totalorder %s2042_s26, %s2038_s19  ;;  %p2046_p13 = scmp.lt.u32.totalorder %s2038_s19, %s2470_s8 }
 0x3cc   : > { %p2040_p7 = pnand %p2039_p6, %p2176_p4 }
 0x3cd   : > { %p2045_p12 = por %p2044_p11, %p2043_p10 }
 0x3ce   : > { %p2041_p9 = pneg %p2040_p7 }
 0x3cf   : > { %p2047_p0 = por %p2046_p13, %p2045_p12 }
 0x3d1   : > { %p2048_p1 = pnand %p2047_p0, %p2041_p9 }
 0x3d3   : > { %2051 = shalt.err (!%p2048_p1)
}
 0x3d4   : > { %1911 = dma.vmem_to_hbm [thread:$0]  (%p2176_p4), %s2472_s5, 128, %s2470_s8, %s1660_s15  }
 0x3d5 PF: > { %p1917_p2 = scmp.ge.s32.totalorder %s2102_s17, 2  ;;  %s1686_s29 = sand.u32 1, %s2082_s12  }
 0x3d6   : > { %s1687_s30 = scalar_lea.sflag [#allocation4], %s1686_s29 }
 0x3d7   : > { %p1914_p3 = pnand %p1917_p2, %p2183_p8 }
 0x3d9   : > { %2077 = dma.done.wait (!%p1914_p3), %s1687_s30, 128  }
 0x3da   : > { %2079 = vsyncadd (!%p1914_p3), %s1687_s30, 4294967168  ;;  %s16_s17 = sadd.s32 1, %s2102_s17   ;;  %s2523_s12 = smov %s2086_s13 }
 0x3db   : > { %p13_p5 = scmp.ge.s32.totalorder %s16_s17, 4   ;;  %s2524_s13 = smov %s2090_s14 }
 0x3dc   : > { %s2525_s14 = smov %s2189_s25  ;;  %s2526_s15 = smov %s2098_s16 }
 0x3dd   : > { %s2527_s16 = smov %s2529_s20  ;;  %15 = sbr.rel (!%p13_p5) target bundleno = 4 (0x4), region = 81 }
 0x3e4   :  { %1692 = vsyncpa [#allocation4], 1 }
 0x3e5   :  { %1694 = vsyncpa [#allocation4 + $0x1], 1 }

</bundles_post_ra>
